<compile_context>
chip_gen: v5e
topology: v5e:2x2
jax: 0.10.0
libtpu: 0.0.40
codegen_flags: <defaults>
</compile_context>

<pallas_src>
import math
import numpy as np
import jax
import jax.numpy as jnp
from jax.experimental import pallas as pl
from jax.experimental.pallas import tpu as pltpu  # noqa: F401  (TPU backend target)

# --- small, module-consistent hyperparameters (scaled down from the original) ---
B = 2          # batch
S = 8          # sequence length
D_MODEL = 32   # hidden size
N_HEADS = 4    # attention heads
D_K = 8        # per-head key dim
D_V = 8        # per-head value dim
D_FF = 128     # feed-forward inner dim

_HD = N_HEADS * D_K   # fused head width (= N_HEADS * D_V here)


def _encoder_layer_kernel(
    x_ref, mask_ref,
    wqkv_ref, bqkv_ref, wo_ref, p4_ref, w1_ref, b1_ref, w2_ref,
    ffn_out_ref, attn_out_ref, attn_ref,
):
    x2 = x_ref[...]                          # (B*S, D_MODEL) folded rows
    mask = mask_ref[...] != 0                # (B, S, S) bool, True => masked

    # Fused QKV projection: one (B*S, D) @ (D, 3*H*Dk) MXU matmul.
    qkv = jnp.dot(x2, wqkv_ref[...], preferred_element_type=jnp.float32) + bqkv_ref[...]
    q3 = qkv[:, 0:_HD].reshape(B, S, _HD)            # tile-aligned row regroup
    k3 = qkv[:, _HD:2 * _HD].reshape(B, S, _HD)
    v3 = qkv[:, 2 * _HD:3 * _HD].reshape(B, S, _HD)

    inv_sqrt_dk = 1.0 / math.sqrt(D_K)
    attn_pieces = []
    proj = None
    for h in range(N_HEADS):                 # static unroll; each step batched over B
        qh = q3[:, :, h * D_K:(h + 1) * D_K]             # (B, S, D_K)
        kh = k3[:, :, h * D_K:(h + 1) * D_K]             # (B, S, D_K)
        vh = v3[:, :, h * D_V:(h + 1) * D_V]             # (B, S, D_V)

        s = jnp.einsum('bqd,bkd->bqk', qh, kh,
                       preferred_element_type=jnp.float32) * inv_sqrt_dk
        s = jnp.where(mask, -1e9, s)                      # masked_fill_(mask, -1e9)

        m = jnp.max(s, axis=-1, keepdims=True)
        e = jnp.exp(s - m)
        p = e * (1.0 / jnp.sum(e, axis=-1, keepdims=True))   # softmax(dim=-1)
        attn_pieces.append(p)                             # (B, S, S)

        ctx_h = jnp.einsum('bqk,bkd->bqd', p, vh,
                           preferred_element_type=jnp.float32)     # (B, S, D_V)
        # Fold the output projection into the head loop: sum_h ctx_h @ W_O[h-rows]
        term = jnp.dot(ctx_h.reshape(B * S, D_V),
                       wo_ref[h * D_V:(h + 1) * D_V, :],
                       preferred_element_type=jnp.float32)          # (B*S, D_MODEL)
        proj = term if proj is None else proj + term

    bo = p4_ref[0:1, :]
    ln_g = p4_ref[1:2, :]
    ln_b = p4_ref[2:3, :]
    b2 = p4_ref[3:4, :]

    # residual + LayerNorm (eps = 1e-5, biased variance), rsqrt on the EUP
    res = proj + bo + x2
    mean = jnp.mean(res, axis=-1, keepdims=True)
    var = jnp.mean((res - mean) ** 2, axis=-1, keepdims=True)
    ln = (res - mean) * jax.lax.rsqrt(var + 1e-5) * ln_g + ln_b
    attn_out_ref[...] = ln

    # position-wise feed-forward: fc1 -> exact gelu (erf) -> fc2 (no residual)
    a = jnp.dot(ln, w1_ref[...], preferred_element_type=jnp.float32) + b1_ref[...]
    g = a * 0.5 * (1.0 + jax.lax.erf(a * (1.0 / math.sqrt(2.0))))
    ffn_out_ref[...] = jnp.dot(g, w2_ref[...], preferred_element_type=jnp.float32) + b2

    # lane-dense attention probs: single (B, S, N_HEADS*S) store (32 lanes)
    attn_ref[...] = jnp.concatenate(attn_pieces, axis=-1)


@jax.jit
def encoder_layer(x, mask_i32, params):
    """x: (B, S, D_MODEL) f32, mask_i32: (B, S, S) int32 (nonzero = masked)."""
    (wq, bq, wk, bk, wv, bv, wo, bo, ln_g, ln_b, w1, b1, w2, b2) = params

    # Operand fusion (wrapper-side layout plumbing is free):
    wqkv = jnp.concatenate([wq, wk, wv], axis=1)        # (D_MODEL, 3*H*D_K)
    bqkv = jnp.concatenate([bq, bk, bv], axis=1)        # (1, 3*H*D_K)
    p4 = jnp.concatenate([bo, ln_g, ln_b, b2], axis=0)  # (4, D_MODEL)
    x2d = x.reshape(B * S, D_MODEL)

    ffn2, ao2, attn3 = pl.pallas_call(
        _encoder_layer_kernel,
        out_shape=(
            jax.ShapeDtypeStruct((B * S, D_MODEL), jnp.float32),       # ffn_out (folded)
            jax.ShapeDtypeStruct((B * S, D_MODEL), jnp.float32),       # attn_out (post-LN)
            jax.ShapeDtypeStruct((B, S, N_HEADS * S), jnp.float32),    # attn probs, lane-dense
        ),
    )(x2d, mask_i32, wqkv, bqkv, wo, p4, w1, b1, w2)

    ffn_out = ffn2.reshape(B, S, D_MODEL)
    attn_out = ao2.reshape(B, S, D_MODEL)
    attn = attn3.reshape(B, S, N_HEADS, S).transpose(0, 2, 1, 3)        # (B, H, S, S)
    return ffn_out, attn_out, attn


def init_params(key):
    """Deterministic synthetic parameters (Linear weights stored as (in, out))."""
    ks = jax.random.split(key, 8)
    s = 0.05
    wq = s * jax.random.normal(ks[0], (D_MODEL, N_HEADS * D_K), jnp.float32)
    wk = s * jax.random.normal(ks[1], (D_MODEL, N_HEADS * D_K), jnp.float32)
    wv = s * jax.random.normal(ks[2], (D_MODEL, N_HEADS * D_V), jnp.float32)
    wo = s * jax.random.normal(ks[3], (N_HEADS * D_V, D_MODEL), jnp.float32)
    w1 = s * jax.random.normal(ks[4], (D_MODEL, D_FF), jnp.float32)
    w2 = s * jax.random.normal(ks[5], (D_FF, D_MODEL), jnp.float32)
    bq = 0.01 * jax.random.normal(ks[6], (1, N_HEADS * D_K), jnp.float32)
    bk = jnp.zeros((1, N_HEADS * D_K), jnp.float32)
    bv = jnp.zeros((1, N_HEADS * D_V), jnp.float32)
    bo = 0.01 * jax.random.normal(ks[7], (1, D_MODEL), jnp.float32)
    ln_g = jnp.ones((1, D_MODEL), jnp.float32)
    ln_b = jnp.zeros((1, D_MODEL), jnp.float32)
    b1 = jnp.zeros((1, D_FF), jnp.float32)
    b2 = jnp.zeros((1, D_MODEL), jnp.float32)
    return (wq, bq, wk, bk, wv, bv, wo, bo, ln_g, ln_b, w1, b1, w2, b2)


def reference(x, mask_i32, params):
    """Pure-JAX reference mirroring the PyTorch forward (for verification)."""
    (wq, bq, wk, bk, wv, bv, wo, bo, ln_g, ln_b, w1, b1, w2, b2) = params
    q = (x @ wq + bq).reshape(B, S, N_HEADS, D_K).transpose(0, 2, 1, 3)
    k = (x @ wk + bk).reshape(B, S, N_HEADS, D_K).transpose(0, 2, 1, 3)
    v = (x @ wv + bv).reshape(B, S, N_HEADS, D_V).transpose(0, 2, 1, 3)
    scores = jnp.einsum("bhqd,bhkd->bhqk", q, k) / np.sqrt(D_K)
    scores = jnp.where(mask_i32[:, None, :, :] != 0, -1e9, scores)
    attn = jax.nn.softmax(scores, axis=-1)
    ctx = jnp.einsum("bhqk,bhkd->bhqd", attn, v)
    ctx = ctx.transpose(0, 2, 1, 3).reshape(B, S, N_HEADS * D_V)
    out = ctx @ wo + bo + x
    mean = out.mean(-1, keepdims=True)
    var = ((out - mean) ** 2).mean(-1, keepdims=True)
    ln = (out - mean) / jnp.sqrt(var + 1e-5) * ln_g + ln_b
    a = ln @ w1 + b1
    g = a * 0.5 * (1.0 + jax.lax.erf(a / math.sqrt(2.0)))
    ffn = g @ w2 + b2
    return ffn, ln, attn


if __name__ == "__main__":
    key = jax.random.PRNGKey(0)
    kx, km, kp = jax.random.split(key, 3)

    x = jax.random.normal(kx, (B, S, D_MODEL), jnp.float32)
    # mask: last 2 key positions masked for every query (like a padding mask)
    pad = jnp.zeros((B, S), jnp.int32).at[:, -2:].set(1)
    mask_i32 = jnp.broadcast_to(pad[:, None, :], (B, S, S)).astype(jnp.int32)

    params = init_params(kp)

    ffn_out, attn_out, attn = encoder_layer(x, mask_i32, params)
    jax.block_until_ready((ffn_out, attn_out, attn))

    ffn_ref, attn_out_ref_, attn_probs_ref = reference(x, mask_i32, params)
    np.testing.assert_allclose(np.asarray(ffn_out), np.asarray(ffn_ref), rtol=1e-5, atol=1e-5)
    np.testing.assert_allclose(np.asarray(attn_out), np.asarray(attn_out_ref_), rtol=1e-5, atol=1e-5)
    np.testing.assert_allclose(np.asarray(attn), np.asarray(attn_probs_ref), rtol=1e-5, atol=1e-5)

    print("KERNEL_OK")
</pallas_src>

<mosaic_0001>
module attributes {stable_mosaic.version = 11 : i64} {
  func.func @_encoder_layer_kernel(%arg0: memref<16x32xf32, #tpu.memory_space<vmem>>, %arg1: memref<2x8x8xi32, #tpu.memory_space<vmem>>, %arg2: memref<32x96xf32, #tpu.memory_space<vmem>>, %arg3: memref<1x96xf32, #tpu.memory_space<vmem>>, %arg4: memref<32x32xf32, #tpu.memory_space<vmem>>, %arg5: memref<4x32xf32, #tpu.memory_space<vmem>>, %arg6: memref<32x128xf32, #tpu.memory_space<vmem>>, %arg7: memref<1x128xf32, #tpu.memory_space<vmem>>, %arg8: memref<128x32xf32, #tpu.memory_space<vmem>>, %arg9: memref<16x32xf32, #tpu.memory_space<vmem>>, %arg10: memref<16x32xf32, #tpu.memory_space<vmem>>, %arg11: memref<2x8x32xf32, #tpu.memory_space<vmem>>) attributes {dimension_semantics = [], scalar_prefetch = 0 : i64, scratch_operands = 0 : i64, tpu.core_type = #tpu.core_type<tc>} {
    %c0 = arith.constant 0 : index
    %c0_0 = arith.constant 0 : index
    %0 = vector.load %arg0[%c0, %c0_0] : memref<16x32xf32, #tpu.memory_space<vmem>>, vector<16x32xf32>
    %c0_1 = arith.constant 0 : index
    %c0_2 = arith.constant 0 : index
    %c0_3 = arith.constant 0 : index
    %1 = vector.load %arg1[%c0_1, %c0_2, %c0_3] : memref<2x8x8xi32, #tpu.memory_space<vmem>>, vector<2x8x8xi32>
    %c0_i32 = arith.constant 0 : i32
    %2 = vector.broadcast %c0_i32 : i32 to vector<2x8x8xi32>
    %3 = arith.cmpi ne, %1, %2 : vector<2x8x8xi32>
    %c0_4 = arith.constant 0 : index
    %c0_5 = arith.constant 0 : index
    %4 = vector.load %arg2[%c0_4, %c0_5] : memref<32x96xf32, #tpu.memory_space<vmem>>, vector<32x96xf32>
    %cst = arith.constant dense<0.000000e+00> : vector<16x96xf32>
    %5 = tpu.matmul %0, %4, %cst {dimension_numbers = #tpu.dot_dimension_numbers<[1], [0], [0], [1], [0, 0, 1, 1], [], []>} : vector<16x32xf32>, vector<32x96xf32>, vector<16x96xf32> -> vector<16x96xf32>
    %c0_6 = arith.constant 0 : index
    %c0_7 = arith.constant 0 : index
    %6 = vector.load %arg3[%c0_6, %c0_7] : memref<1x96xf32, #tpu.memory_space<vmem>>, vector<1x96xf32>
    %7 = vector.broadcast %6 : vector<1x96xf32> to vector<16x96xf32>
    %8 = arith.addf %5, %7 : vector<16x96xf32>
    %9 = vector.extract_strided_slice %8 {offsets = [0, 0], sizes = [16, 32], strides = [1, 1]} : vector<16x96xf32> to vector<16x32xf32>
    %10 = vector.shape_cast %9 : vector<16x32xf32> to vector<2x8x32xf32>
    %11 = vector.extract_strided_slice %8 {offsets = [0, 32], sizes = [16, 32], strides = [1, 1]} : vector<16x96xf32> to vector<16x32xf32>
    %12 = vector.shape_cast %11 : vector<16x32xf32> to vector<2x8x32xf32>
    %13 = vector.extract_strided_slice %8 {offsets = [0, 64], sizes = [16, 32], strides = [1, 1]} : vector<16x96xf32> to vector<16x32xf32>
    %14 = vector.shape_cast %13 : vector<16x32xf32> to vector<2x8x32xf32>
    %15 = vector.extract_strided_slice %10 {offsets = [0, 0, 0], sizes = [2, 8, 8], strides = [1, 1, 1]} : vector<2x8x32xf32> to vector<2x8x8xf32>
    %16 = vector.extract_strided_slice %12 {offsets = [0, 0, 0], sizes = [2, 8, 8], strides = [1, 1, 1]} : vector<2x8x32xf32> to vector<2x8x8xf32>
    %17 = vector.extract_strided_slice %14 {offsets = [0, 0, 0], sizes = [2, 8, 8], strides = [1, 1, 1]} : vector<2x8x32xf32> to vector<2x8x8xf32>
    "tpu.trace_start"() <{level = 10 : i32, message = "bqd,bkd->bqk"}> : () -> ()
    %cst_8 = arith.constant dense<0.000000e+00> : vector<2x8x8xf32>
    %18 = tpu.matmul %15, %16, %cst_8 {dimension_numbers = #tpu.dot_dimension_numbers<[2], [2], [1], [1], [0, 0, 0, 1, 1, 1], [0], [0]>} : vector<2x8x8xf32>, vector<2x8x8xf32>, vector<2x8x8xf32> -> vector<2x8x8xf32>
    "tpu.trace_stop"() : () -> ()
    %cst_9 = arith.constant 0.353553385 : f32
    %19 = vector.broadcast %cst_9 : f32 to vector<2x8x8xf32>
    %20 = arith.mulf %18, %19 : vector<2x8x8xf32>
    %cst_10 = arith.constant -1.000000e+09 : f32
    %21 = vector.broadcast %cst_10 : f32 to vector<2x8x8xf32>
    %22 = arith.select %3, %21, %20 : vector<2x8x8xi1>, vector<2x8x8xf32>
    %cst_11 = arith.constant dense<0xFF800000> : vector<2x8xf32>
    %23 = vector.multi_reduction <maximumf>, %22, %cst_11 [2] : vector<2x8x8xf32> to vector<2x8xf32>
    %24 = vector.shape_cast %23 : vector<2x8xf32> to vector<2x8x1xf32>
    %25 = vector.broadcast %24 : vector<2x8x1xf32> to vector<2x8x8xf32>
    %26 = arith.subf %22, %25 : vector<2x8x8xf32>
    %27 = math.exp %26 : vector<2x8x8xf32>
    %cst_12 = arith.constant dense<0.000000e+00> : vector<2x8xf32>
    %28 = vector.multi_reduction <add>, %27, %cst_12 [2] : vector<2x8x8xf32> to vector<2x8xf32>
    %29 = vector.shape_cast %28 : vector<2x8xf32> to vector<2x8x1xf32>
    %cst_13 = arith.constant 1.000000e+00 : f32
    %30 = vector.broadcast %cst_13 : f32 to vector<2x8x1xf32>
    %31 = arith.divf %30, %29 : vector<2x8x1xf32>
    %32 = vector.broadcast %31 : vector<2x8x1xf32> to vector<2x8x8xf32>
    %33 = arith.mulf %27, %32 : vector<2x8x8xf32>
    "tpu.trace_start"() <{level = 10 : i32, message = "bqk,bkd->bqd"}> : () -> ()
    %cst_14 = arith.constant dense<0.000000e+00> : vector<2x8x8xf32>
    %34 = tpu.matmul %33, %17, %cst_14 {dimension_numbers = #tpu.dot_dimension_numbers<[2], [1], [1], [2], [0, 0, 0, 1, 1, 2], [0], [0]>} : vector<2x8x8xf32>, vector<2x8x8xf32>, vector<2x8x8xf32> -> vector<2x8x8xf32>
    "tpu.trace_stop"() : () -> ()
    %35 = vector.shape_cast %34 : vector<2x8x8xf32> to vector<16x8xf32>
    %c0_15 = arith.constant 0 : index
    %c0_16 = arith.constant 0 : index
    %36 = vector.load %arg4[%c0_15, %c0_16] : memref<32x32xf32, #tpu.memory_space<vmem>>, vector<8x32xf32>
    %cst_17 = arith.constant dense<0.000000e+00> : vector<16x32xf32>
    %37 = tpu.matmul %35, %36, %cst_17 {dimension_numbers = #tpu.dot_dimension_numbers<[1], [0], [0], [1], [0, 0, 1, 1], [], []>} : vector<16x8xf32>, vector<8x32xf32>, vector<16x32xf32> -> vector<16x32xf32>
    %38 = vector.extract_strided_slice %10 {offsets = [0, 0, 8], sizes = [2, 8, 8], strides = [1, 1, 1]} : vector<2x8x32xf32> to vector<2x8x8xf32>
    %39 = vector.extract_strided_slice %12 {offsets = [0, 0, 8], sizes = [2, 8, 8], strides = [1, 1, 1]} : vector<2x8x32xf32> to vector<2x8x8xf32>
    %40 = vector.extract_strided_slice %14 {offsets = [0, 0, 8], sizes = [2, 8, 8], strides = [1, 1, 1]} : vector<2x8x32xf32> to vector<2x8x8xf32>
    "tpu.trace_start"() <{level = 10 : i32, message = "bqd,bkd->bqk"}> : () -> ()
    %cst_18 = arith.constant dense<0.000000e+00> : vector<2x8x8xf32>
    %41 = tpu.matmul %38, %39, %cst_18 {dimension_numbers = #tpu.dot_dimension_numbers<[2], [2], [1], [1], [0, 0, 0, 1, 1, 1], [0], [0]>} : vector<2x8x8xf32>, vector<2x8x8xf32>, vector<2x8x8xf32> -> vector<2x8x8xf32>
    "tpu.trace_stop"() : () -> ()
    %cst_19 = arith.constant 0.353553385 : f32
    %42 = vector.broadcast %cst_19 : f32 to vector<2x8x8xf32>
    %43 = arith.mulf %41, %42 : vector<2x8x8xf32>
    %cst_20 = arith.constant -1.000000e+09 : f32
    %44 = vector.broadcast %cst_20 : f32 to vector<2x8x8xf32>
    %45 = arith.select %3, %44, %43 : vector<2x8x8xi1>, vector<2x8x8xf32>
    %cst_21 = arith.constant dense<0xFF800000> : vector<2x8xf32>
    %46 = vector.multi_reduction <maximumf>, %45, %cst_21 [2] : vector<2x8x8xf32> to vector<2x8xf32>
    %47 = vector.shape_cast %46 : vector<2x8xf32> to vector<2x8x1xf32>
    %48 = vector.broadcast %47 : vector<2x8x1xf32> to vector<2x8x8xf32>
    %49 = arith.subf %45, %48 : vector<2x8x8xf32>
    %50 = math.exp %49 : vector<2x8x8xf32>
    %cst_22 = arith.constant dense<0.000000e+00> : vector<2x8xf32>
    %51 = vector.multi_reduction <add>, %50, %cst_22 [2] : vector<2x8x8xf32> to vector<2x8xf32>
    %52 = vector.shape_cast %51 : vector<2x8xf32> to vector<2x8x1xf32>
    %cst_23 = arith.constant 1.000000e+00 : f32
    %53 = vector.broadcast %cst_23 : f32 to vector<2x8x1xf32>
    %54 = arith.divf %53, %52 : vector<2x8x1xf32>
    %55 = vector.broadcast %54 : vector<2x8x1xf32> to vector<2x8x8xf32>
    %56 = arith.mulf %50, %55 : vector<2x8x8xf32>
    "tpu.trace_start"() <{level = 10 : i32, message = "bqk,bkd->bqd"}> : () -> ()
    %cst_24 = arith.constant dense<0.000000e+00> : vector<2x8x8xf32>
    %57 = tpu.matmul %56, %40, %cst_24 {dimension_numbers = #tpu.dot_dimension_numbers<[2], [1], [1], [2], [0, 0, 0, 1, 1, 2], [0], [0]>} : vector<2x8x8xf32>, vector<2x8x8xf32>, vector<2x8x8xf32> -> vector<2x8x8xf32>
    "tpu.trace_stop"() : () -> ()
    %58 = vector.shape_cast %57 : vector<2x8x8xf32> to vector<16x8xf32>
    %c8 = arith.constant 8 : index
    %c0_25 = arith.constant 0 : index
    %59 = vector.load %arg4[%c8, %c0_25] : memref<32x32xf32, #tpu.memory_space<vmem>>, vector<8x32xf32>
    %cst_26 = arith.constant dense<0.000000e+00> : vector<16x32xf32>
    %60 = tpu.matmul %58, %59, %cst_26 {dimension_numbers = #tpu.dot_dimension_numbers<[1], [0], [0], [1], [0, 0, 1, 1], [], []>} : vector<16x8xf32>, vector<8x32xf32>, vector<16x32xf32> -> vector<16x32xf32>
    %61 = arith.addf %37, %60 : vector<16x32xf32>
    %62 = vector.extract_strided_slice %10 {offsets = [0, 0, 16], sizes = [2, 8, 8], strides = [1, 1, 1]} : vector<2x8x32xf32> to vector<2x8x8xf32>
    %63 = vector.extract_strided_slice %12 {offsets = [0, 0, 16], sizes = [2, 8, 8], strides = [1, 1, 1]} : vector<2x8x32xf32> to vector<2x8x8xf32>
    %64 = vector.extract_strided_slice %14 {offsets = [0, 0, 16], sizes = [2, 8, 8], strides = [1, 1, 1]} : vector<2x8x32xf32> to vector<2x8x8xf32>
    "tpu.trace_start"() <{level = 10 : i32, message = "bqd,bkd->bqk"}> : () -> ()
    %cst_27 = arith.constant dense<0.000000e+00> : vector<2x8x8xf32>
    %65 = tpu.matmul %62, %63, %cst_27 {dimension_numbers = #tpu.dot_dimension_numbers<[2], [2], [1], [1], [0, 0, 0, 1, 1, 1], [0], [0]>} : vector<2x8x8xf32>, vector<2x8x8xf32>, vector<2x8x8xf32> -> vector<2x8x8xf32>
    "tpu.trace_stop"() : () -> ()
    %cst_28 = arith.constant 0.353553385 : f32
    %66 = vector.broadcast %cst_28 : f32 to vector<2x8x8xf32>
    %67 = arith.mulf %65, %66 : vector<2x8x8xf32>
    %cst_29 = arith.constant -1.000000e+09 : f32
    %68 = vector.broadcast %cst_29 : f32 to vector<2x8x8xf32>
    %69 = arith.select %3, %68, %67 : vector<2x8x8xi1>, vector<2x8x8xf32>
    %cst_30 = arith.constant dense<0xFF800000> : vector<2x8xf32>
    %70 = vector.multi_reduction <maximumf>, %69, %cst_30 [2] : vector<2x8x8xf32> to vector<2x8xf32>
    %71 = vector.shape_cast %70 : vector<2x8xf32> to vector<2x8x1xf32>
    %72 = vector.broadcast %71 : vector<2x8x1xf32> to vector<2x8x8xf32>
    %73 = arith.subf %69, %72 : vector<2x8x8xf32>
    %74 = math.exp %73 : vector<2x8x8xf32>
    %cst_31 = arith.constant dense<0.000000e+00> : vector<2x8xf32>
    %75 = vector.multi_reduction <add>, %74, %cst_31 [2] : vector<2x8x8xf32> to vector<2x8xf32>
    %76 = vector.shape_cast %75 : vector<2x8xf32> to vector<2x8x1xf32>
    %cst_32 = arith.constant 1.000000e+00 : f32
    %77 = vector.broadcast %cst_32 : f32 to vector<2x8x1xf32>
    %78 = arith.divf %77, %76 : vector<2x8x1xf32>
    %79 = vector.broadcast %78 : vector<2x8x1xf32> to vector<2x8x8xf32>
    %80 = arith.mulf %74, %79 : vector<2x8x8xf32>
    "tpu.trace_start"() <{level = 10 : i32, message = "bqk,bkd->bqd"}> : () -> ()
    %cst_33 = arith.constant dense<0.000000e+00> : vector<2x8x8xf32>
    %81 = tpu.matmul %80, %64, %cst_33 {dimension_numbers = #tpu.dot_dimension_numbers<[2], [1], [1], [2], [0, 0, 0, 1, 1, 2], [0], [0]>} : vector<2x8x8xf32>, vector<2x8x8xf32>, vector<2x8x8xf32> -> vector<2x8x8xf32>
    "tpu.trace_stop"() : () -> ()
    %82 = vector.shape_cast %81 : vector<2x8x8xf32> to vector<16x8xf32>
    %c16 = arith.constant 16 : index
    %c0_34 = arith.constant 0 : index
    %83 = vector.load %arg4[%c16, %c0_34] : memref<32x32xf32, #tpu.memory_space<vmem>>, vector<8x32xf32>
    %cst_35 = arith.constant dense<0.000000e+00> : vector<16x32xf32>
    %84 = tpu.matmul %82, %83, %cst_35 {dimension_numbers = #tpu.dot_dimension_numbers<[1], [0], [0], [1], [0, 0, 1, 1], [], []>} : vector<16x8xf32>, vector<8x32xf32>, vector<16x32xf32> -> vector<16x32xf32>
    %85 = arith.addf %61, %84 : vector<16x32xf32>
    %86 = vector.extract_strided_slice %10 {offsets = [0, 0, 24], sizes = [2, 8, 8], strides = [1, 1, 1]} : vector<2x8x32xf32> to vector<2x8x8xf32>
    %87 = vector.extract_strided_slice %12 {offsets = [0, 0, 24], sizes = [2, 8, 8], strides = [1, 1, 1]} : vector<2x8x32xf32> to vector<2x8x8xf32>
    %88 = vector.extract_strided_slice %14 {offsets = [0, 0, 24], sizes = [2, 8, 8], strides = [1, 1, 1]} : vector<2x8x32xf32> to vector<2x8x8xf32>
    "tpu.trace_start"() <{level = 10 : i32, message = "bqd,bkd->bqk"}> : () -> ()
    %cst_36 = arith.constant dense<0.000000e+00> : vector<2x8x8xf32>
    %89 = tpu.matmul %86, %87, %cst_36 {dimension_numbers = #tpu.dot_dimension_numbers<[2], [2], [1], [1], [0, 0, 0, 1, 1, 1], [0], [0]>} : vector<2x8x8xf32>, vector<2x8x8xf32>, vector<2x8x8xf32> -> vector<2x8x8xf32>
    "tpu.trace_stop"() : () -> ()
    %cst_37 = arith.constant 0.353553385 : f32
    %90 = vector.broadcast %cst_37 : f32 to vector<2x8x8xf32>
    %91 = arith.mulf %89, %90 : vector<2x8x8xf32>
    %cst_38 = arith.constant -1.000000e+09 : f32
    %92 = vector.broadcast %cst_38 : f32 to vector<2x8x8xf32>
    %93 = arith.select %3, %92, %91 : vector<2x8x8xi1>, vector<2x8x8xf32>
    %cst_39 = arith.constant dense<0xFF800000> : vector<2x8xf32>
    %94 = vector.multi_reduction <maximumf>, %93, %cst_39 [2] : vector<2x8x8xf32> to vector<2x8xf32>
    %95 = vector.shape_cast %94 : vector<2x8xf32> to vector<2x8x1xf32>
    %96 = vector.broadcast %95 : vector<2x8x1xf32> to vector<2x8x8xf32>
    %97 = arith.subf %93, %96 : vector<2x8x8xf32>
    %98 = math.exp %97 : vector<2x8x8xf32>
    %cst_40 = arith.constant dense<0.000000e+00> : vector<2x8xf32>
    %99 = vector.multi_reduction <add>, %98, %cst_40 [2] : vector<2x8x8xf32> to vector<2x8xf32>
    %100 = vector.shape_cast %99 : vector<2x8xf32> to vector<2x8x1xf32>
    %cst_41 = arith.constant 1.000000e+00 : f32
    %101 = vector.broadcast %cst_41 : f32 to vector<2x8x1xf32>
    %102 = arith.divf %101, %100 : vector<2x8x1xf32>
    %103 = vector.broadcast %102 : vector<2x8x1xf32> to vector<2x8x8xf32>
    %104 = arith.mulf %98, %103 : vector<2x8x8xf32>
    "tpu.trace_start"() <{level = 10 : i32, message = "bqk,bkd->bqd"}> : () -> ()
    %cst_42 = arith.constant dense<0.000000e+00> : vector<2x8x8xf32>
    %105 = tpu.matmul %104, %88, %cst_42 {dimension_numbers = #tpu.dot_dimension_numbers<[2], [1], [1], [2], [0, 0, 0, 1, 1, 2], [0], [0]>} : vector<2x8x8xf32>, vector<2x8x8xf32>, vector<2x8x8xf32> -> vector<2x8x8xf32>
    "tpu.trace_stop"() : () -> ()
    %106 = vector.shape_cast %105 : vector<2x8x8xf32> to vector<16x8xf32>
    %c24 = arith.constant 24 : index
    %c0_43 = arith.constant 0 : index
    %107 = vector.load %arg4[%c24, %c0_43] : memref<32x32xf32, #tpu.memory_space<vmem>>, vector<8x32xf32>
    %cst_44 = arith.constant dense<0.000000e+00> : vector<16x32xf32>
    %108 = tpu.matmul %106, %107, %cst_44 {dimension_numbers = #tpu.dot_dimension_numbers<[1], [0], [0], [1], [0, 0, 1, 1], [], []>} : vector<16x8xf32>, vector<8x32xf32>, vector<16x32xf32> -> vector<16x32xf32>
    %109 = arith.addf %85, %108 : vector<16x32xf32>
    %c0_45 = arith.constant 0 : index
    %c0_46 = arith.constant 0 : index
    %110 = vector.load %arg5[%c0_45, %c0_46] : memref<4x32xf32, #tpu.memory_space<vmem>>, vector<1x32xf32>
    %c1 = arith.constant 1 : index
    %c0_47 = arith.constant 0 : index
    %111 = vector.load %arg5[%c1, %c0_47] : memref<4x32xf32, #tpu.memory_space<vmem>>, vector<1x32xf32>
    %c2 = arith.constant 2 : index
    %c0_48 = arith.constant 0 : index
    %112 = vector.load %arg5[%c2, %c0_48] : memref<4x32xf32, #tpu.memory_space<vmem>>, vector<1x32xf32>
    %c3 = arith.constant 3 : index
    %c0_49 = arith.constant 0 : index
    %113 = vector.load %arg5[%c3, %c0_49] : memref<4x32xf32, #tpu.memory_space<vmem>>, vector<1x32xf32>
    %114 = vector.broadcast %110 : vector<1x32xf32> to vector<16x32xf32>
    %115 = arith.addf %109, %114 : vector<16x32xf32>
    %116 = arith.addf %115, %0 : vector<16x32xf32>
    %cst_50 = arith.constant dense<0.000000e+00> : vector<16xf32>
    %117 = vector.multi_reduction <add>, %116, %cst_50 [1] : vector<16x32xf32> to vector<16xf32>
    %118 = vector.shape_cast %117 : vector<16xf32> to vector<16x1xf32>
    %cst_51 = arith.constant 3.200000e+01 : f32
    %119 = vector.broadcast %cst_51 : f32 to vector<16x1xf32>
    %120 = arith.divf %118, %119 : vector<16x1xf32>
    %121 = vector.broadcast %120 : vector<16x1xf32> to vector<16x32xf32>
    %122 = arith.subf %116, %121 : vector<16x32xf32>
    %123 = arith.mulf %122, %122 : vector<16x32xf32>
    %cst_52 = arith.constant dense<0.000000e+00> : vector<16xf32>
    %124 = vector.multi_reduction <add>, %123, %cst_52 [1] : vector<16x32xf32> to vector<16xf32>
    %125 = vector.shape_cast %124 : vector<16xf32> to vector<16x1xf32>
    %cst_53 = arith.constant 3.200000e+01 : f32
    %126 = vector.broadcast %cst_53 : f32 to vector<16x1xf32>
    %127 = arith.divf %125, %126 : vector<16x1xf32>
    %128 = vector.broadcast %120 : vector<16x1xf32> to vector<16x32xf32>
    %129 = arith.subf %116, %128 : vector<16x32xf32>
    %cst_54 = arith.constant 9.99999974E-6 : f32
    %130 = vector.broadcast %cst_54 : f32 to vector<16x1xf32>
    %131 = arith.addf %127, %130 : vector<16x1xf32>
    %132 = math.rsqrt %131 : vector<16x1xf32>
    %133 = vector.broadcast %132 : vector<16x1xf32> to vector<16x32xf32>
    %134 = arith.mulf %129, %133 : vector<16x32xf32>
    %135 = vector.broadcast %111 : vector<1x32xf32> to vector<16x32xf32>
    %136 = arith.mulf %134, %135 : vector<16x32xf32>
    %137 = vector.broadcast %112 : vector<1x32xf32> to vector<16x32xf32>
    %138 = arith.addf %136, %137 : vector<16x32xf32>
    %c0_55 = arith.constant 0 : index
    %c0_56 = arith.constant 0 : index
    %139 = vector.load %arg10[%c0_55, %c0_56] : memref<16x32xf32, #tpu.memory_space<vmem>>, vector<16x32xf32>
    tpu.vector_store %arg10[%c0_55, %c0_56], %138 {strides = array<i32>} : memref<16x32xf32, #tpu.memory_space<vmem>>, vector<16x32xf32>,
    %c0_57 = arith.constant 0 : index
    %c0_58 = arith.constant 0 : index
    %140 = vector.load %arg6[%c0_57, %c0_58] : memref<32x128xf32, #tpu.memory_space<vmem>>, vector<32x128xf32>
    %cst_59 = arith.constant dense<0.000000e+00> : vector<16x128xf32>
    %141 = tpu.matmul %138, %140, %cst_59 {dimension_numbers = #tpu.dot_dimension_numbers<[1], [0], [0], [1], [0, 0, 1, 1], [], []>} : vector<16x32xf32>, vector<32x128xf32>, vector<16x128xf32> -> vector<16x128xf32>
    %c0_60 = arith.constant 0 : index
    %c0_61 = arith.constant 0 : index
    %142 = vector.load %arg7[%c0_60, %c0_61] : memref<1x128xf32, #tpu.memory_space<vmem>>, vector<1x128xf32>
    %143 = vector.broadcast %142 : vector<1x128xf32> to vector<16x128xf32>
    %144 = arith.addf %141, %143 : vector<16x128xf32>
    %cst_62 = arith.constant 5.000000e-01 : f32
    %145 = vector.broadcast %cst_62 : f32 to vector<16x128xf32>
    %146 = arith.mulf %144, %145 : vector<16x128xf32>
    %cst_63 = arith.constant 0.707106769 : f32
    %147 = vector.broadcast %cst_63 : f32 to vector<16x128xf32>
    %148 = arith.mulf %144, %147 : vector<16x128xf32>
    %149 = math.erf %148 : vector<16x128xf32>
    %cst_64 = arith.constant 1.000000e+00 : f32
    %150 = vector.broadcast %cst_64 : f32 to vector<16x128xf32>
    %151 = arith.addf %150, %149 : vector<16x128xf32>
    %152 = arith.mulf %146, %151 : vector<16x128xf32>
    %c0_65 = arith.constant 0 : index
    %c0_66 = arith.constant 0 : index
    %153 = vector.load %arg8[%c0_65, %c0_66] : memref<128x32xf32, #tpu.memory_space<vmem>>, vector<128x32xf32>
    %cst_67 = arith.constant dense<0.000000e+00> : vector<16x32xf32>
    %154 = tpu.matmul %152, %153, %cst_67 {dimension_numbers = #tpu.dot_dimension_numbers<[1], [0], [0], [1], [0, 0, 1, 1], [], []>} : vector<16x128xf32>, vector<128x32xf32>, vector<16x32xf32> -> vector<16x32xf32>
    %155 = vector.broadcast %113 : vector<1x32xf32> to vector<16x32xf32>
    %156 = arith.addf %154, %155 : vector<16x32xf32>
    %c0_68 = arith.constant 0 : index
    %c0_69 = arith.constant 0 : index
    %157 = vector.load %arg9[%c0_68, %c0_69] : memref<16x32xf32, #tpu.memory_space<vmem>>, vector<16x32xf32>
    tpu.vector_store %arg9[%c0_68, %c0_69], %156 {strides = array<i32>} : memref<16x32xf32, #tpu.memory_space<vmem>>, vector<16x32xf32>,
    %158 = tpu.concatenate %33, %56, %80, %104 in 2 : vector<2x8x8xf32>, vector<2x8x8xf32>, vector<2x8x8xf32>, vector<2x8x8xf32> -> vector<2x8x32xf32>
    %c0_70 = arith.constant 0 : index
    %c0_71 = arith.constant 0 : index
    %c0_72 = arith.constant 0 : index
    %159 = vector.load %arg11[%c0_70, %c0_71, %c0_72] : memref<2x8x32xf32, #tpu.memory_space<vmem>>, vector<2x8x32xf32>
    tpu.vector_store %arg11[%c0_70, %c0_71, %c0_72], %158 {strides = array<i32>} : memref<2x8x32xf32, #tpu.memory_space<vmem>>, vector<2x8x32xf32>,
    return
  }
}

</mosaic_0001>

<bundles_post_ra>
// kernel: encoder_layer.1
= control target key start
LH: loop header
LB: loop body
LE: loop exit
PB: predicated region body
PF: predicated region fallthrough
CT: control target
= control target key end

     0   :  { %17 = vsyncpa [#allocation3], 0  ;;  %s1717_s0 = inlined_call_operand.vmem [shape: f32[16,32], index: 0, kind: input, shape index: {}]   ;;  %s1718_s1 = inlined_call_operand.vmem [shape: s32[2,8,8], index: 1, kind: input, shape index: {}]   ;;  %s1719_s2 = inlined_call_operand.vmem [shape: f32[32,96], index: 2, kind: input, shape index: {}]   ;;  %s1720_s3 = inlined_call_operand.vmem [shape: f32[1,96], index: 3, kind: input, shape index: {}]   ;;  %s1721_s4 = inlined_call_operand.vmem [shape: f32[32,32], index: 4, kind: input, shape index: {}]   ;;  %s1722_s5 = inlined_call_operand.vmem [shape: f32[4,32], index: 5, kind: input, shape index: {}]   ;;  %s1723_s6 = inlined_call_operand.vmem [shape: f32[32,128], index: 6, kind: input, shape index: {}]   ;;  %s1724_s7 = inlined_call_operand.vmem [shape: f32[1,128], index: 7, kind: input, shape index: {}]   ;;  %s1725_s8 = inlined_call_operand.vmem [shape: f32[128,32], index: 8, kind: input, shape index: {}]   ;;  %s1726_s9 = inlined_call_operand.hbm [shape: f32[16,32], index: 9, kind: output, shape index: {0}]   ;;  %s1727_s10 = inlined_call_operand.hbm [shape: f32[16,32], index: 10, kind: output, shape index: {1}]   ;;  %s1728_s11 = inlined_call_operand.vmem [shape: f32[2,8,32], index: 11, kind: output, shape index: {2}]  }
   0x1   :  { %v46_v0 = vld [vmem:[%s1719_s2 + $0x18] sm:$0xff]  ;;  %v45_v1 = vld [vmem:[%s1719_s2 + $0x10] sm:$0xff]  ;;  %v44_v2 = vld [vmem:[%s1719_s2 + $0x8] sm:$0xff] }
   0x2   :  { %70 = vmatpush.msra.mxu0 %v46_v0  ;;  %v43_v3 = vld [vmem:[%s1719_s2] sm:$0xff] }
   0x4   :  { %71 = vmatpush.msra.mxu0 %v45_v1 }
   0x5   :  { %18 = vsyncpa [#allocation5], 0  ;;  %v1404_v4 = vld [vmem:[%s1717_s0] sm:$0xff]  ;;  %vm51_vm0 = vcmask 261120   ;;  %v1411_v5 = vld [vmem:[%s1717_s0 + $0x8] sm:$0xff]  ;;  %s1311_s30 = smov 88  }
   0x6   :  { %72 = vmatpush.msra.mxu0 %v44_v2  ;;  %v1211_v6 = vld [vmem:[%s1720_s3] ss:$0 sm:$0xff]  ;;  %s1312_s12 = smov 96   ;;  %s1313_s0 = smov 120   ;;  %vm84_vm1 = vcmask 64512   ;;  %v1453_v26 = vld [vmem:[%s1718_s1 + $0x8] sm:$0xff] }
   0x7   :  { %v1441_v17 = vld [vmem:[%s1718_s1] sm:$0xff]  ;;  %vm42_vm3 = vcmp.ne.s32.totalorder %v1453_v26, 0  ;;  %s1314_s16 = smov 64   ;;  %s1315_s1 = smov 112  }
   0x8   :  { %73 = vmatpush.msra.mxu0 %v43_v3  ;;  %vm41_vm2 = vcmp.ne.s32.totalorder %v1441_v17, 0  ;;  %s1316_s17 = smov 56   ;;  %s1317_s18 = smov 80  }
   0x9   :  { %1155 = vmatmul.msk.f32.vlgmr.msra.gmra.mxu0 %vm51_vm0, %v1404_v4  ;;  %s1318_s19 = smov 72   ;;  %s1319_s24 = smov 48  }
   0xa   :  { %s1320_s25 = smov 104   ;;  %s1321_s28 = smov 40  }
   0xb   :  { %s1325_s3 = smov 16   ;;  %s1134_s15 = sshll.u32 %s1727_s10, 4  ;;  %s1135_s15 = int_to_ptr.hbm [resolvable:$true] %s1134_s15 }
   0xc   :  { %s1121_s20 = sshll.u32 %s1726_s9, 4  ;;  %s1122_s20 = int_to_ptr.hbm [resolvable:$true] %s1121_s20 }
  0x11   :  { %1156 = vmatmul.msk.f32.gmra.mxu0 %vm51_vm0, %v1411_v5 }
  0x86   :  { %v75_v7 = vpop.f32.mrf.mxu0 }
  0x87   :  { %v1418_v8 = vadd.f32 %v1211_v6, %v75_v7 }
  0x89   :  { %245 = vrot.lane.b32.xlu1 %v1418_v8, %s1311_s30  ;;  %82 = vrot.lane.b32.xlu0 %v1418_v8, %s1312_s12 }
  0x8e   :  { %v78_v9 = vpop.f32.mrf.mxu0 }
  0x8f   :  { %v1422_v10 = vadd.f32 %v1211_v6, %v78_v9 }
  0x91   :  { %273 = vrot.lane.b32.xlu2 %v1422_v10, %s1311_s30  ;;  %243 = vrot.lane.b32.xlu1 %v1418_v8, %s1313_s0 }
  0x92   :  { %110 = vrot.lane.b32.xlu0 %v1422_v10, %s1312_s12 }
  0x99   :  { %271 = vrot.lane.b32.xlu2 %v1422_v10, %s1313_s0  ;;  %s1323_s0 = smov 24  }
  0xeb   :  { %v274_v14 = vpop.permute.xlu2 %273 }
  0xf3   :  { %v272_v16 = vpop.permute.xlu2 %271 }
  0xfb   :  { %v246_v11 = vpop.permute.xlu1 %245  ;;  %v83_v12 = vpop.permute.xlu0 %82 }
  0xfc   :  { %1157 = vmatpush.xpose.msk.msra.mxu1 %vm84_vm1, %v83_v12 }
  0xff   :  { %1158 = vmatmul.msk.f32.vlgmr.msra.gmra.mxu1 %vm84_vm1, %v1418_v8 }
 0x100   :  { %1163 = vmatpush.xpose.msk.msrb.mxu1 %vm84_vm1, %v246_v11 }
 0x103   :  { %v244_v15 = vpop.permute.xlu1 %243 }
 0x104   :  { %v111_v13 = vpop.permute.xlu0 %110 }
 0x105   :  { %1159 = vmatpush.xpose.msk.msra.mxu2 %vm84_vm1, %v111_v13 }
 0x107   :  { %1164 = vmatmul.msk.f32.vlgmr.msrb.gmra.mxu1 %vm84_vm1, %v244_v15 }
 0x108   :  { %1160 = vmatmul.msk.f32.vlgmr.msra.gmra.mxu2 %vm84_vm1, %v1422_v10 }
 0x109   :  { %1165 = vmatpush.xpose.msk.msrb.mxu2 %vm84_vm1, %v274_v14 }
 0x110   :  { %1166 = vmatmul.msk.f32.vlgmr.msrb.gmra.mxu2 %vm84_vm1, %v272_v16 }
 0x17c   :  { %v106_v18 = vpop.f32.mrf.mxu1 }
 0x17d   :  { %v136_v19 = vmul.f32 0.35355338, %v106_v18 }
 0x17f   :  { %v138_v20 = vsel %vm41_vm2, -1e+09, %v136_v19 }
 0x180   :  { %v140_v21 = vsel %vm84_vm1, %v138_v20, -inf }
 0x181   :  { %141 = vmax.xlane.f32.xlu0 %v140_v21 }
 0x184   :  { %v268_v22 = vpop.f32.mrf.mxu1 }
 0x185   :  { %v299_v23 = vmul.f32 0.35355338, %v268_v22 }
 0x187   :  { %v301_v24 = vsel %vm41_vm2, -1e+09, %v299_v23 }
 0x188   :  { %v303_v25 = vsel %vm84_vm1, %v301_v24, -inf }
 0x189   :  { %304 = vmax.xlane.f32.xlu2 %v303_v25 }
 0x18b   :  { %v133_v27 = vpop.f32.mrf.mxu2 }
 0x18c   :  { %v137_v28 = vmul.f32 0.35355338, %v133_v27 }
 0x18e   :  { %v139_v29 = vsel %vm42_vm3, -1e+09, %v137_v28 }
 0x18f   :  { %v143_v30 = vsel %vm84_vm1, %v139_v29, -inf }
 0x190   :  { %144 = vmax.xlane.f32.xlu1 %v143_v30 }
 0x193   :  { %v296_v46 = vpop.f32.mrf.mxu2 }
 0x194   :  { %v300_v47 = vmul.f32 0.35355338, %v296_v46 }
 0x195   :  { %216 = vrot.lane.b32.xlu0 %v1422_v10, %s1314_s16 }
 0x196   :  { %v1477_v48 = vsel %vm42_vm3, -1e+09, %v300_v47  ;;  %v242_v47 = vld [vmem:[%s1721_s4] sm:$0xff] }
 0x197   :  { %v306_v49 = vsel %vm84_vm1, %v1477_v48, -inf }
 0x1f4   :  { %v142_v31 = vpop.xlane.xlu0 %141 }
 0x1f5   :  { %v146_v32 = vsub.f32 %v138_v20, %v142_v31 }
 0x1f7   :  { %v148_v33 = vmul.f32 1.442695, %v146_v32 }
 0x1f9   :  { %1217 = vpow2.f32 %v148_v33 }
 0x1fc   :  { %v305_v34 = vpop.xlane.xlu2 %304 }
 0x1fd   :  { %v309_v35 = vsub.f32 %v301_v24, %v305_v34 }
 0x1ff   :  { %v1218_v36 = vpop.eup %1217  ;;  %v311_v37 = vmul.f32 1.442695, %v309_v35 }
 0x200   :  { %v152_v38 = vsel %vm84_vm1, %v1218_v36, 0.0 }
 0x201   :  { %1219 = vpow2.f32 %v311_v37  ;;  %153 = vadd.xlane.f32.xlu2 %v152_v38 }
 0x203   :  { %v145_v39 = vpop.xlane.xlu1 %144 }
 0x204   :  { %v147_v40 = vsub.f32 %v139_v29, %v145_v39  ;;  %v405_v39 = vld [vmem:[%s1721_s4 + $0x8] sm:$0xff] }
 0x205   :  { %427 = vmatpush.msrb.mxu0 %v405_v39 }
 0x206   :  { %v150_v41 = vmul.f32 1.442695, %v147_v40 }
 0x207   :  { %v1461_v42 = vpop.eup %1219  ;;  %v217_v52 = vpop.permute.xlu0 %216  ;;  %456 = vmatpush.msra.mxu0 %v242_v47 }
 0x208   :  { %1221 = vpow2.f32 %v150_v41  ;;  %v315_v43 = vsel %vm84_vm1, %v1461_v42, 0.0 }
 0x209   :  { %316 = vadd.xlane.f32.xlu1 %v315_v43 }
 0x20e   :  { %v1465_v44 = vpop.eup %1221 }
 0x20f   :  { %v155_v45 = vsel %vm84_vm1, %v1465_v44, 0.0 }
 0x210   :  { %156 = vadd.xlane.f32.xlu0 %v155_v45 }
 0x219   :  { %190 = vrot.lane.b32.xlu2 %v1418_v8, %s1314_s16  ;;  %s1327_s16 = smov 128  }
 0x221   :  { %464 = vrot.lane.b32.xlu2 %v1418_v8, %s1315_s1 }
 0x222   :  { %353 = vrot.lane.b32.xlu1 %v1418_v8, %s1316_s17 }
 0x224   :  { %466 = vrot.lane.b32.xlu0 %v1418_v8, %s1317_s18 }
 0x229   :  { %379 = vrot.lane.b32.xlu2 %v1422_v10, %s1316_s17  ;;  %s1328_s17 = smov [#allocation2]  }
 0x24c   :  { %307 = vmax.xlane.f32.xlu1 %v306_v49 }
 0x265   :  { %492 = vrot.lane.b32.xlu1 %v1422_v10, %s1315_s1 }
 0x274   :  { %v154_v50 = vpop.xlane.xlu2 %153 }
 0x275   :  { %1223 = vrcp.f32 %v154_v50  ;;  %v169_v58 = vand.u32 2147483648, %v154_v50  ;;  %v167_v59 = vand.u32 2147483647, %v154_v50  ;;  %vm163_vm5 = vweird.f32 %v154_v50 }
 0x277   :  { %v170_v63 = vor.u32 1.1754944e-38, %v169_v58  ;;  %vm168_vm7 = vcmp.eq.f32.partialorder %v167_v59, 8.507059e+37 }
 0x27b   :  { %v1224_v51 = vpop.eup %1223 }
 0x27c   :  { %v159_v53 = vmul.f32 %v1224_v51, %v154_v50  ;;  %v317_v54 = vpop.xlane.xlu1 %316  ;;  %v191_v55 = vpop.permute.xlu2 %190  ;;  %vm164_vm4 = vweird.f32 %v1224_v51 }
 0x27d   :  { %211 = vmatpush.msra.mxu3 %v191_v55  ;;  %1225 = vrcp.f32 %v317_v54  ;;  %vm165_vm6 = vmor %vm163_vm5, %vm164_vm4  ;;  %v332_v23 = vand.u32 2147483648, %v317_v54  ;;  %vm326_vm13 = vweird.f32 %v317_v54  ;;  %v330_v27 = vand.u32 2147483647, %v317_v54 }
 0x27e   :  { %v160_v56 = vsub.f32 1.0, %v159_v53 }
 0x27f   :  { %237 = vmatpush.msrb.mxu3 %v217_v52  ;;  %v333_v31 = vor.u32 1.1754944e-38, %v332_v23  ;;  %vm331_vm15 = vcmp.eq.f32.partialorder %v330_v27, 8.507059e+37 }
 0x280   :  { %v161_v57 = vmul.f32 %v1224_v51, %v160_v56 }
 0x282   :  { %v162_v60 = vadd.f32 %v1224_v51, %v161_v57 }
 0x283   :  { %v157_v61 = vpop.xlane.xlu0 %156  ;;  %v1226_v62 = vpop.eup %1225 }
 0x284   :  { %1227 = vrcp.f32 %v157_v61  ;;  %v465_v0 = vpop.permute.xlu2 %464  ;;  %v166_v1 = vsel %vm165_vm6, %v1224_v51, %v162_v60  ;;  %v322_v3 = vmul.f32 %v1226_v62, %v317_v54  ;;  %v184_v14 = vand.u32 2147483648, %v157_v61 }
 0x285   :  { %v171_v2 = vsel %vm168_vm7, %v170_v63, %v166_v1  ;;  %v182_v18 = vand.u32 2147483647, %v157_v61  ;;  %vm178_vm9 = vweird.f32 %v157_v61  ;;  %vm327_vm11 = vweird.f32 %v1226_v62 }
 0x286   :  { %v1482_v6 = vmul.f32 %v1218_v36, %v171_v2  ;;  %v323_v9 = vsub.f32 1.0, %v322_v3  ;;  %v185_v20 = vor.u32 1.1754944e-38, %v184_v14  ;;  %vm328_vm14 = vmor %vm326_vm13, %vm327_vm11 }
 0x287   :  { %vm183_vm12 = vcmp.eq.f32.partialorder %v182_v18, 8.507059e+37 }
 0x288   :  { %1161 = vmatmul.msk.f32.vlgmr.msra.gmra.mxu3 %vm84_vm1, %v1482_v6  ;;  %v324_v15 = vmul.f32 %v1226_v62, %v323_v9 }
 0x28a   :  { %v1228_v7 = vpop.eup %1227  ;;  %v325_v21 = vadd.f32 %v1226_v62, %v324_v15 }
 0x28b   :  { %v174_v11 = vmul.f32 %v1228_v7, %v157_v61  ;;  %vm179_vm8 = vweird.f32 %v1228_v7 }
 0x28c   :  { %v380_v12 = vpop.permute.xlu2 %379  ;;  %vm180_vm10 = vmor %vm178_vm9, %vm179_vm8  ;;  %v329_v30 = vsel %vm328_vm14, %v1226_v62, %v325_v21 }
 0x28d   :  { %v175_v13 = vsub.f32 1.0, %v174_v11  ;;  %400 = vmatpush.msra.mxu1 %v380_v12  ;;  %v334_v32 = vsel %vm331_vm15, %v333_v31, %v329_v30 }
 0x28e   :  { %v1493_v33 = vmul.f32 %v1461_v42, %v334_v32 }
 0x28f   :  { %v176_v16 = vmul.f32 %v1228_v7, %v175_v13 }
 0x291   :  { %v177_v19 = vadd.f32 %v1228_v7, %v176_v16 }
 0x293   :  { %v181_v22 = vsel %vm180_vm10, %v1228_v7, %v177_v19 }
 0x294   :  { %v354_v24 = vpop.permute.xlu1 %353  ;;  %v186_v25 = vsel %vm183_vm12, %v185_v20, %v181_v22 }
 0x295   :  { %374 = vmatpush.msra.mxu3 %v354_v24  ;;  %v1487_v28 = vmul.f32 %v1465_v44, %v186_v25 }
 0x296   :  { %v467_v29 = vpop.permute.xlu0 %466 }
 0x297   :  { %1162 = vmatmul.msk.f32.vlgmr.msrb.gmra.mxu3 %vm84_vm1, %v1487_v28 }
 0x298   :  { %1173 = vmatpush.xpose.msk.msrb.mxu3 %vm84_vm1, %v467_v29 }
 0x29f   :  { %1167 = vmatmul.msk.f32.vlgmr.msra.gmra.mxu3 %vm84_vm1, %v1493_v33 }
 0x2a7   :  { %1174 = vmatmul.msk.f32.vlgmr.msrb.gmra.mxu3 %vm84_vm1, %v465_v0 }
 0x2bf   :  { %v308_v34 = vpop.xlane.xlu1 %307 }
 0x2c0   :  { %v310_v35 = vsub.f32 %v1477_v48, %v308_v34 }
 0x2c2   :  { %v313_v36 = vmul.f32 1.442695, %v310_v35 }
 0x2c4   :  { %1229 = vpow2.f32 %v313_v36 }
 0x2ca   :  { %v1230_v37 = vpop.eup %1229 }
 0x2cb   :  { %v318_v38 = vsel %vm84_vm1, %v1230_v37, 0.0 }
 0x2cc   :  { %319 = vadd.xlane.f32.xlu0 %v318_v38 }
 0x2d7   :  { %v493_v61 = vpop.permute.xlu1 %492 }
 0x2e0   :  { %494 = vrot.lane.b32.xlu0 %v1422_v10, %s1317_s18  ;;  %s1119_s18 = sshll.u32 %s1328_s17, 4  ;;  %s1120_s18 = int_to_ptr.vmem [resolvable:$true] %s1119_s18 }
 0x2e8   :  { %660 = vrot.lane.b32.xlu0 %v1418_v8, %s1318_s19 }
 0x2f0   :  { %688 = vrot.lane.b32.xlu0 %v1422_v10, %s1318_s19 }
 0x30b   :  { %v213_v40 = vpop.f32.mrf.mxu3 }
 0x31a   :  { %v239_v41 = vpop.f32.mrf.mxu3 }
 0x322   :  { %v376_v42 = vpop.f32.mrf.mxu3 }
 0x323   :  { %1169 = vmatmul.msk.f32.vlgmr.msrb.gmra.mxu0 %vm84_vm1, %v376_v42 }
 0x32a   :  { %v489_v43 = vpop.f32.mrf.mxu3 }
 0x32b   :  { %v520_v44 = vmul.f32 0.35355338, %v489_v43  ;;  %v626_v43 = vld [vmem:[%s1721_s4 + $0x10] sm:$0xff] }
 0x32c   :  { %648 = vmatpush.msra.mxu2 %v626_v43 }
 0x32d   :  { %v522_v45 = vsel %vm41_vm2, -1e+09, %v520_v44 }
 0x32e   :  { %v524_v46 = vsel %vm84_vm1, %v522_v45, -inf }
 0x32f   :  { %525 = vmax.xlane.f32.xlu2 %v524_v46 }
 0x33f   :  { %v320_v48 = vpop.xlane.xlu0 %319 }
 0x340   :  { %1231 = vrcp.f32 %v320_v48  ;;  %v347_v52 = vand.u32 2147483648, %v320_v48  ;;  %v345_v54 = vand.u32 2147483647, %v320_v48  ;;  %vm341_vm5 = vweird.f32 %v320_v48 }
 0x342   :  { %v348_v56 = vor.u32 1.1754944e-38, %v347_v52  ;;  %vm346_vm7 = vcmp.eq.f32.partialorder %v345_v54, 8.507059e+37 }
 0x346   :  { %v1232_v49 = vpop.eup %1231 }
 0x347   :  { %v337_v50 = vmul.f32 %v1232_v49, %v320_v48  ;;  %574 = vrot.lane.b32.xlu2 %v1418_v8, %s1319_s24  ;;  %vm342_vm4 = vweird.f32 %v1232_v49 }
 0x348   :  { %vm343_vm6 = vmor %vm341_vm5, %vm342_vm4 }
 0x349   :  { %v338_v51 = vsub.f32 1.0, %v337_v50 }
 0x34b   :  { %v339_v53 = vmul.f32 %v1232_v49, %v338_v51 }
 0x34d   :  { %v340_v55 = vadd.f32 %v1232_v49, %v339_v53 }
 0x34f   :  { %v344_v57 = vsel %vm343_vm6, %v1232_v49, %v340_v55  ;;  %686 = vrot.lane.b32.xlu2 %v1422_v10, %s1320_s25 }
 0x350   :  { %v349_v58 = vsel %vm346_vm7, %v348_v56, %v344_v57 }
 0x351   :  { %v1517_v59 = vmul.f32 %v1230_v37, %v349_v58 }
 0x352   :  { %v495_v60 = vpop.permute.xlu0 %494 }
 0x353   :  { %1168 = vmatmul.msk.f32.vlgmr.msra.gmra.mxu1 %vm84_vm1, %v1517_v59 }
 0x354   :  { %1175 = vmatpush.xpose.msk.msrb.mxu1 %vm84_vm1, %v495_v60 }
 0x35a   :  { %v661_v62 = vpop.permute.xlu0 %660 }
 0x35b   :  { %1176 = vmatmul.msk.f32.vlgmr.msrb.gmra.mxu1 %vm84_vm1, %v493_v61  ;;  %1181 = vmatpush.xpose.msk.msrb.mxu0 %vm84_vm1, %v661_v62 }
 0x362   :  { %v689_v3 = vpop.permute.xlu0 %688 }
 0x3a0   :  { %v429_v34 = vpop.f32.mrf.mxu0 }
 0x3a2   :  { %v526_v63 = vpop.xlane.xlu2 %525 }
 0x3a3   :  { %v530_v0 = vsub.f32 %v522_v45, %v526_v63 }
 0x3a5   :  { %v532_v1 = vmul.f32 1.442695, %v530_v0 }
 0x3a7   :  { %1233 = vpow2.f32 %v532_v1 }
 0x3aa   :  { %v575_v2 = vpop.permute.xlu2 %574 }
 0x3ab   :  { %595 = vmatpush.msra.mxu3 %v575_v2 }
 0x3ad   :  { %1183 = vmatpush.xpose.msk.msrb.mxu3 %vm84_vm1, %v689_v3  ;;  %v1234_v7 = vpop.eup %1233 }
 0x3ae   :  { %v536_v9 = vsel %vm84_vm1, %v1234_v7, 0.0 }
 0x3af   :  { %537 = vadd.xlane.f32.xlu1 %v536_v9 }
 0x3b2   :  { %v687_v32 = vpop.permute.xlu2 %686 }
 0x3c8   :  { %658 = vrot.lane.b32.xlu1 %v1418_v8, %s1320_s25 }
 0x3d0   :  { %v402_v11 = vpop.f32.mrf.mxu1 }
 0x3d1   :  { %1170 = vmatmul.msk.f32.gmra.mxu0 %vm84_vm1, %v402_v11 }
 0x3d8   :  { %v517_v12 = vpop.f32.mrf.mxu1 }
 0x3d9   :  { %v521_v13 = vmul.f32 0.35355338, %v517_v12  ;;  %1171 = vmatmul.msk.f32.vlgmr.msra.gmra.mxu0 %vm84_vm1, %v213_v40 }
 0x3db   :  { %v523_v14 = vsel %vm42_vm3, -1e+09, %v521_v13 }
 0x3dc   :  { %v527_v15 = vsel %vm84_vm1, %v523_v14, -inf }
 0x3dd   :  { %528 = vmax.xlane.f32.xlu0 %v527_v15 }
 0x3e1   :  { %1172 = vmatmul.msk.f32.gmra.mxu0 %vm84_vm1, %v239_v41 }
 0x422   :  { %v538_v16 = vpop.xlane.xlu1 %537 }
 0x423   :  { %1235 = vrcp.f32 %v538_v16  ;;  %v553_v21 = vand.u32 2147483648, %v538_v16  ;;  %v551_v23 = vand.u32 2147483647, %v538_v16  ;;  %vm547_vm9 = vweird.f32 %v538_v16 }
 0x425   :  { %v554_v25 = vor.u32 1.1754944e-38, %v553_v21  ;;  %vm552_vm11 = vcmp.eq.f32.partialorder %v551_v23, 8.507059e+37 }
 0x429   :  { %v1236_v18 = vpop.eup %1235 }
 0x42a   :  { %v543_v19 = vmul.f32 %v1236_v18, %v538_v16  ;;  %vm548_vm8 = vweird.f32 %v1236_v18 }
 0x42b   :  { %vm549_vm10 = vmor %vm547_vm9, %vm548_vm8 }
 0x42c   :  { %v544_v20 = vsub.f32 1.0, %v543_v19 }
 0x42e   :  { %v545_v22 = vmul.f32 %v1236_v18, %v544_v20 }
 0x430   :  { %v546_v24 = vadd.f32 %v1236_v18, %v545_v22 }
 0x432   :  { %v550_v27 = vsel %vm549_vm10, %v1236_v18, %v546_v24 }
 0x433   :  { %v555_v29 = vsel %vm552_vm11, %v554_v25, %v550_v27  ;;  %vm1107_vm11 = vcmask 130048  }
 0x434   :  { %v1533_v30 = vmul.f32 %v1234_v7, %v555_v29 }
 0x436   :  { %1177 = vmatmul.msk.f32.vlgmr.msra.gmra.mxu3 %vm84_vm1, %v1533_v30 }
 0x43a   :  { %v659_v31 = vpop.permute.xlu1 %658 }
 0x43b   :  { %1182 = vmatmul.msk.f32.vlgmr.msrb.gmra.mxu0 %vm84_vm1, %v659_v31 }
 0x43e   :  { %1184 = vmatmul.msk.f32.vlgmr.msrb.gmra.mxu3 %vm84_vm1, %v687_v32 }
 0x44e   :  { %v1539_v35 = vpop.f32.mrf.mxu0 }
 0x450   :  { %v529_v36 = vpop.xlane.xlu0 %528 }
 0x451   :  { %v531_v37 = vsub.f32 %v523_v14, %v529_v36 }
 0x453   :  { %v534_v38 = vmul.f32 1.442695, %v531_v37 }
 0x455   :  { %1237 = vpow2.f32 %v534_v38 }
 0x456   :  { %v458_v39 = vpop.f32.mrf.mxu0 }
 0x457   :  { %v1541_v40 = vadd.f32 %v458_v39, %v429_v34 }
 0x45b   :  { %v1238_v41 = vpop.eup %1237 }
 0x45c   :  { %v539_v42 = vsel %vm84_vm1, %v1238_v41, 0.0 }
 0x45d   :  { %540 = vadd.xlane.f32.xlu0 %v539_v42 }
 0x45e   :  { %v1549_v44 = vpop.f32.mrf.mxu0 }
 0x471   :  { %600 = vrot.lane.b32.xlu0 %v1422_v10, %s1319_s24 }
 0x4b8   :  { %v683_v45 = vpop.f32.mrf.mxu0 }
 0x4b9   :  { %v714_v46 = vmul.f32 0.35355338, %v683_v45  ;;  %v597_v47 = vpop.f32.mrf.mxu3 }
 0x4ba   :  { %1179 = vmatmul.msk.f32.vlgmr.msra.gmra.mxu2 %vm84_vm1, %v597_v47 }
 0x4bb   :  { %v716_v48 = vsel %vm41_vm2, -1e+09, %v714_v46 }
 0x4bc   :  { %v718_v49 = vsel %vm84_vm1, %v716_v48, -inf }
 0x4bd   :  { %719 = vmax.xlane.f32.xlu1 %v718_v49 }
 0x4c1   :  { %v711_v50 = vpop.f32.mrf.mxu3 }
 0x4c2   :  { %v715_v51 = vmul.f32 0.35355338, %v711_v50  ;;  %v820_v50 = vld [vmem:[%s1721_s4 + $0x18] sm:$0xff]  ;;  %s1322_s4 = smov 8  }
 0x4c3   :  { %842 = vmatpush.msra.mxu3 %v820_v50 }
 0x4c4   :  { %v717_v52 = vsel %vm42_vm3, -1e+09, %v715_v51 }
 0x4c5   :  { %v721_v53 = vsel %vm84_vm1, %v717_v52, -inf }
 0x4c6   :  { %722 = vmax.xlane.f32.xlu2 %v721_v53 }
 0x4d0   :  { %v541_v54 = vpop.xlane.xlu0 %540 }
 0x4d1   :  { %1239 = vrcp.f32 %v541_v54  ;;  %v568_v58 = vand.u32 2147483648, %v541_v54  ;;  %v566_v17 = vand.u32 2147483647, %v541_v54  ;;  %vm562_vm2 = vweird.f32 %v541_v54 }
 0x4d3   :  { %v569_v62 = vor.u32 1.1754944e-38, %v568_v58  ;;  %vm567_vm14 = vcmp.eq.f32.partialorder %v566_v17, 8.507059e+37  ;;  %v462_v17 = vadd.f32 %v1549_v44, %v1539_v35  ;;  %v1324_v35 = vmov 32.0  }
 0x4d7   :  { %v1240_v55 = vpop.eup %1239 }
 0x4d8   :  { %v558_v56 = vmul.f32 %v1240_v55, %v541_v54  ;;  %vm563_vm12 = vweird.f32 %v1240_v55 }
 0x4d9   :  { %vm564_vm13 = vmor %vm562_vm2, %vm563_vm12  ;;  %vm1110_vm12 = vcmask 195584  }
 0x4da   :  { %v559_v57 = vsub.f32 1.0, %v558_v56 }
 0x4dc   :  { %v560_v60 = vmul.f32 %v1240_v55, %v559_v57 }
 0x4de   :  { %v561_v61 = vadd.f32 %v1240_v55, %v560_v60 }
 0x4e0   :  { %v565_v63 = vsel %vm564_vm13, %v1240_v55, %v561_v61  ;;  %v1212_v55 = vld [vmem:[%s1722_s5] ss:$0 sm:$0xff] }
 0x4e1   :  { %v570_v26 = vsel %vm567_vm14, %v569_v62, %v565_v63 }
 0x4e2   :  { %v1558_v0 = vmul.f32 %v1238_v41, %v570_v26 }
 0x4e3   :  { %v601_v1 = vpop.permute.xlu0 %600 }
 0x4e4   :  { %621 = vmatpush.msra.mxu1 %v601_v1 }
 0x4e5   :  { %1178 = vmatmul.msk.f32.vlgmr.msra.gmra.mxu1 %vm84_vm1, %v1558_v0 }
 0x530   :  { %v720_v2 = vpop.xlane.xlu1 %719 }
 0x531   :  { %v724_v3 = vsub.f32 %v716_v48, %v720_v2 }
 0x533   :  { %v726_v7 = vmul.f32 1.442695, %v724_v3 }
 0x535   :  { %1241 = vpow2.f32 %v726_v7 }
 0x539   :  { %v723_v9 = vpop.xlane.xlu2 %722 }
 0x53a   :  { %v725_v11 = vsub.f32 %v717_v52, %v723_v9 }
 0x53b   :  { %v1242_v12 = vpop.eup %1241 }
 0x53c   :  { %v728_v13 = vmul.f32 1.442695, %v725_v11  ;;  %v730_v14 = vsel %vm84_vm1, %v1242_v12, 0.0 }
 0x53d   :  { %731 = vadd.xlane.f32.xlu1 %v730_v14  ;;  %v650_v53 = vpop.f32.mrf.mxu2 }
 0x53e   :  { %1243 = vpow2.f32 %v728_v13  ;;  %v656_v54 = vadd.f32 %v650_v53, %v1541_v40 }
 0x544   :  { %v1244_v15 = vpop.eup %1243 }
 0x545   :  { %v733_v16 = vsel %vm84_vm1, %v1244_v15, 0.0 }
 0x546   :  { %734 = vadd.xlane.f32.xlu2 %v733_v16 }
 0x556   :  { %768 = vrot.lane.b32.xlu1 %v1418_v8, %s1321_s28 }
 0x55e   :  { %794 = vrot.lane.b32.xlu2 %v1422_v10, %s1321_s28 }
 0x562   :  { %v623_v18 = vpop.f32.mrf.mxu1 }
 0x563   :  { %1180 = vmatmul.msk.f32.gmra.mxu2 %vm84_vm1, %v623_v18 }
 0x5b0   :  { %v732_v19 = vpop.xlane.xlu1 %731 }
 0x5b1   :  { %1245 = vrcp.f32 %v732_v19  ;;  %v747_v27 = vand.u32 2147483648, %v732_v19  ;;  %vm741_vm15 = vweird.f32 %v732_v19  ;;  %v745_v31 = vand.u32 2147483647, %v732_v19 }
 0x5b3   :  { %v748_v34 = vor.u32 1.1754944e-38, %v747_v27  ;;  %vm746_vm5 = vcmp.eq.f32.partialorder %v745_v31, 8.507059e+37 }
 0x5b7   :  { %v1246_v20 = vpop.eup %1245 }
 0x5b8   :  { %v737_v21 = vmul.f32 %v1246_v20, %v732_v19  ;;  %vm742_vm3 = vweird.f32 %v1246_v20 }
 0x5b9   :  { %v735_v22 = vpop.xlane.xlu2 %734  ;;  %vm743_vm4 = vmor %vm741_vm15, %vm742_vm3 }
 0x5ba   :  { %v738_v23 = vsub.f32 1.0, %v737_v21  ;;  %1247 = vrcp.f32 %v735_v22  ;;  %v762_v37 = vand.u32 2147483648, %v735_v22  ;;  %v760_v41 = vand.u32 2147483647, %v735_v22 }
 0x5bb   :  { %vm756_vm7 = vweird.f32 %v735_v22  ;;  %1249 = vrcp.f32 %v1324_v35  ;;  %v1215_v35 = vld [vmem:[%s1724_s7] ss:$0 sm:$0xff] }
 0x5bc   :  { %v739_v24 = vmul.f32 %v1246_v20, %v738_v23  ;;  %v763_v43 = vor.u32 1.1754944e-38, %v762_v37  ;;  %vm761_vm9 = vcmp.eq.f32.partialorder %v760_v41, 8.507059e+37  ;;  %v922_v23 = vld [vmem:[%s1723_s6 + $0x10] sm:$0xff] }
 0x5be   :  { %v740_v25 = vadd.f32 %v1246_v20, %v739_v24 }
 0x5c0   :  { %v1248_v29 = vpop.eup %1247  ;;  %v744_v32 = vsel %vm743_vm4, %v1246_v20, %v740_v25 }
 0x5c1   :  { %v752_v8 = vmul.f32 %v1248_v29, %v735_v22  ;;  %v795_v10 = vpop.permute.xlu2 %794  ;;  %v749_v38 = vsel %vm746_vm5, %v748_v34, %v744_v32  ;;  %vm757_vm6 = vweird.f32 %v1248_v29  ;;  %v923_v22 = vld [vmem:[%s1723_s6 + $0x18] sm:$0xff] }
 0x5c2   :  { %815 = vmatpush.msra.mxu0 %v795_v10  ;;  %vm758_vm8 = vmor %vm756_vm7, %vm757_vm6  ;;  %v766_v46 = vmul.f32 %v1242_v12, %v749_v38 }
 0x5c3   :  { %v753_v36 = vsub.f32 1.0, %v752_v8 }
 0x5c5   :  { %v754_v39 = vmul.f32 %v1248_v29, %v753_v36 }
 0x5c7   :  { %v755_v42 = vadd.f32 %v1248_v29, %v754_v39 }
 0x5c8   :  { %v769_v45 = vpop.permute.xlu1 %768 }
 0x5c9   :  { %v759_v47 = vsel %vm758_vm8, %v1248_v29, %v755_v42  ;;  %789 = vmatpush.msrb.mxu1 %v769_v45 }
 0x5ca   :  { %v764_v48 = vsel %vm761_vm9, %v763_v43, %v759_v47  ;;  %1185 = vmatmul.msk.f32.vlgmr.msrb.gmra.mxu1 %vm84_vm1, %v766_v46  ;;  %v1213_v47 = vld [vmem:[%s1722_s5 + $0x1] ss:$0 sm:$0xff] }
 0x5cb   :  { %v767_v49 = vmul.f32 %v1244_v15, %v764_v48  ;;  %946 = vmatpush.msra.mxu1 %v923_v22 }
 0x5cd   :  { %1186 = vmatmul.msk.f32.vlgmr.msra.gmra.mxu0 %vm84_vm1, %v767_v49  ;;  %947 = vmatpush.msra.mxu1 %v922_v23 }
 0x5e6   :  { %v653_v60 = vpop.f32.mrf.mxu2 }
 0x5e7   :  { %v657_v62 = vadd.f32 %v653_v60, %v462_v17 }
 0x647   :  { %v791_v51 = vpop.f32.mrf.mxu1 }
 0x648   :  { %1187 = vmatmul.msk.f32.vlgmr.msra.gmra.mxu3 %vm84_vm1, %v791_v51  ;;  %v1214_v51 = vld [vmem:[%s1722_s5 + $0x2] ss:$0 sm:$0xff] }
 0x64a   :  { %v817_v52 = vpop.f32.mrf.mxu0 }
 0x650   :  { %1188 = vmatmul.msk.f32.gmra.mxu3 %vm84_vm1, %v817_v52 }
 0x6cb   :  { %v844_v56 = vpop.f32.mrf.mxu3 }
 0x6cc   :  { %v850_v57 = vadd.f32 %v844_v56, %v656_v54 }
 0x6ce   :  { %v857_v58 = vadd.f32 %v1212_v55, %v850_v57 }
 0x6d0   :  { %v859_v61 = vadd.f32 %v857_v58, %v1404_v4  ;;  %v1250_v4 = vpop.eup %1249 }
 0x6d1   :  { %v868_v44 = vmul.f32 32.0, %v1250_v4  ;;  %vm872_vm10 = vweird.f32 %v1250_v4 }
 0x6d2   :  { %v861_v63 = vsel %vm51_vm0, %v859_v61, 0.0 }
 0x6d3   :  { %862 = vadd.xlane.f32.xlu0 %v861_v63  ;;  %v847_v26 = vpop.f32.mrf.mxu3  ;;  %v869_v7 = vsub.f32 1.0, %v868_v44  ;;  %v1056_v44 = vld [vmem:[%s1725_s8 + $0x58] sm:$0xff] }
 0x6d4   :  { %v851_v1 = vadd.f32 %v847_v26, %v657_v62 }
 0x6d5   :  { %v870_v9 = vmul.f32 %v1250_v4, %v869_v7 }
 0x6d6   :  { %v858_v40 = vadd.f32 %v1212_v55, %v851_v1 }
 0x6d7   :  { %v871_v11 = vadd.f32 %v1250_v4, %v870_v9 }
 0x6d8   :  { %v860_v2 = vadd.f32 %v858_v40, %v1411_v5 }
 0x6d9   :  { %v873_v12 = vsel %vm872_vm10, %v1250_v4, %v871_v11  ;;  %v1057_v4 = vld [vmem:[%s1725_s8 + $0x60] sm:$0xff]  ;;  %v1055_v11 = vld [vmem:[%s1725_s8 + $0x50] sm:$0xff] }
 0x6da   :  { %v864_v3 = vsel %vm51_vm0, %v860_v2, 0.0 }
 0x6db   :  { %865 = vadd.xlane.f32.xlu1 %v864_v3  ;;  %v1058_v3 = vld [vmem:[%s1725_s8 + $0x68] sm:$0xff] }
 0x6f4   :  { %1087 = vrot.lane.b32.xlu1 %v1493_v33, %s1322_s4 }
 0x6fc   :  { %1099 = vrot.lane.b32.xlu1 %v766_v46, %s1323_s0 }
 0x746   :  { %v863_v13 = vpop.xlane.xlu0 %862 }
 0x747   :  { %v874_v5 = vmul.f32 %v873_v12, %v863_v13  ;;  %v1054_v13 = vld [vmem:[%s1725_s8 + $0x48] sm:$0xff] }
 0x749   :  { %v876_v14 = vsub.f32 %v859_v61, %v874_v5 }
 0x74b   :  { %v878_v15 = vmul.f32 %v876_v14, %v876_v14 }
 0x74d   :  { %v880_v16 = vsel %vm51_vm0, %v878_v15, 0.0 }
 0x74e   :  { %881 = vadd.xlane.f32.xlu2 %v880_v16  ;;  %v866_v18 = vpop.xlane.xlu1 %865  ;;  %v1052_v16 = vld [vmem:[%s1725_s8 + $0x38] sm:$0xff] }
 0x74f   :  { %v875_v33 = vmul.f32 %v873_v12, %v866_v18 }
 0x751   :  { %v1587_v19 = vsub.f32 %v860_v2, %v875_v33  ;;  %v1059_v2 = vld [vmem:[%s1725_s8 + $0x70] sm:$0xff] }
 0x753   :  { %v879_v20 = vmul.f32 %v1587_v19, %v1587_v19 }
 0x755   :  { %v883_v21 = vsel %vm51_vm0, %v879_v20, 0.0 }
 0x756   :  { %884 = vadd.xlane.f32.xlu0 %v883_v21  ;;  %v1051_v21 = vld [vmem:[%s1725_s8 + $0x30] sm:$0xff] }
 0x766   :  { %1093 = vrot.lane.b32.xlu2 %v1533_v30, %s1325_s3  ;;  %v921_v30 = vld [vmem:[%s1723_s6 + $0x8] sm:$0xff] }
 0x767   :  { %948 = vmatpush.msra.mxu1 %v921_v30  ;;  %v1050_v30 = vld [vmem:[%s1725_s8 + $0x28] sm:$0xff] }
 0x76a   :  { %1089 = vrot.lane.b32.xlu0 %v1517_v59, %s1322_s4  ;;  %v920_v59 = vld [vmem:[%s1723_s6] sm:$0xff] }
 0x76b   :  { %949 = vmatpush.msra.mxu1 %v920_v59 }
 0x76e   :  { %1101 = vrot.lane.b32.xlu2 %v767_v49, %s1323_s0 }
 0x772   :  { %1095 = vrot.lane.b32.xlu0 %v1558_v0, %s1325_s3  ;;  %v1088_v0 = vpop.permute.xlu1 %1087 }
 0x773   :  { %v1105_v29 = vsel %vm84_vm1, %v1482_v6, %v1088_v0 }
 0x77a   :  { %v1100_v10 = vpop.permute.xlu1 %1099 }
 0x7c1   :  { %v882_v24 = vpop.xlane.xlu2 %881 }
 0x7c2   :  { %v886_v25 = vmul.f32 %v882_v24, %v873_v12 }
 0x7c4   :  { %v888_v27 = vadd.f32 1e-05, %v886_v25  ;;  %v1049_v25 = vld [vmem:[%s1725_s8 + $0x20] sm:$0xff] }
 0x7c6   :  { %1251 = vrsqrt.f32 %v888_v27  ;;  %vm896_vm13 = vweird.f32 %v888_v27 }
 0x7c9   :  { %v1094_v31 = vpop.permute.xlu2 %1093  ;;  %v885_v8 = vpop.xlane.xlu0 %884 }
 0x7ca   :  { %v1108_v32 = vsel %vm1107_vm11, %v1105_v29, %v1094_v31  ;;  %v887_v34 = vmul.f32 %v885_v8, %v873_v12  ;;  %v1048_v31 = vld [vmem:[%s1725_s8 + $0x18] sm:$0xff] }
 0x7cb   :  { %v1111_v36 = vsel %vm1110_vm12, %v1108_v32, %v1100_v10 }
 0x7cc   :  { %v1252_v37 = vpop.eup %1251  ;;  %1113 = vst.msk [vmem:[%s1728_s11] sm:$0xff] %vm51_vm0, %v1111_v36  ;;  %v889_v38 = vadd.f32 1e-05, %v887_v34  ;;  %v1047_v34 = vld [vmem:[%s1725_s8 + $0x10] sm:$0xff] }
 0x7cd   :  { %v891_v39 = vmul.f32 %v1252_v37, %v888_v27  ;;  %vm897_vm2 = vweird.f32 %v1252_v37 }
 0x7ce   :  { %1253 = vrsqrt.f32 %v889_v38  ;;  %vm898_vm14 = vmor %vm896_vm13, %vm897_vm2  ;;  %vm906_vm15 = vweird.f32 %v889_v38 }
 0x7cf   :  { %v892_v41 = vmul.f32 %v1252_v37, %v891_v39  ;;  %v1046_v39 = vld [vmem:[%s1725_s8 + $0x8] sm:$0xff] }
 0x7d1   :  { %v893_v42 = vmul.f32 0.5, %v892_v41  ;;  %v1102_v26 = vpop.permute.xlu2 %1101 }
 0x7d3   :  { %v894_v6 = vsub.f32 1.5, %v893_v42 }
 0x7d4   :  { %v1254_v43 = vpop.eup %1253 }
 0x7d5   :  { %v895_v45 = vmul.f32 %v1252_v37, %v894_v6  ;;  %v901_v46 = vmul.f32 %v1254_v43, %v889_v38  ;;  %vm907_vm3 = vweird.f32 %v1254_v43  ;;  %v1045_v6 = vld [vmem:[%s1725_s8] sm:$0xff] }
 0x7d6   :  { %vm908_vm4 = vmor %vm906_vm15, %vm907_vm3 }
 0x7d7   :  { %v899_v48 = vsel %vm898_vm14, %v1252_v37, %v895_v45  ;;  %v902_v49 = vmul.f32 %v1254_v43, %v901_v46 }
 0x7d8   :  { %v910_v50 = vmul.f32 %v899_v48, %v876_v14  ;;  %v1053_v14 = vld [vmem:[%s1725_s8 + $0x40] sm:$0xff] }
 0x7d9   :  { %v903_v52 = vmul.f32 0.5, %v902_v49 }
 0x7da   :  { %v913_v53 = vmul.f32 %v1213_v47, %v910_v50 }
 0x7db   :  { %v904_v54 = vsub.f32 1.5, %v903_v52 }
 0x7dc   :  { %v1090_v55 = vpop.permute.xlu0 %1089  ;;  %v916_v56 = vadd.f32 %v1214_v51, %v913_v53 }
 0x7dd   :  { %v905_v57 = vmul.f32 %v1254_v43, %v904_v54  ;;  %v1106_v61 = vsel %vm84_vm1, %v1487_v28, %v1090_v55  ;;  %v1060_v28 = vld [vmem:[%s1725_s8 + $0x78] sm:$0xff]  ;;  %s1326_s8 = smov [#allocation4]  }
 0x7de   :  { %1189 = vmatmul.msk.f32.vlgmr.msra.gmra.mxu1 %vm51_vm0, %v916_v56  ;;  %918 = vst.msk [vmem:[#allocation4] sm:$0xff] %vm51_vm0, %v916_v56  ;;  %1062 = vmatpush.msrb.mxu2 %v1060_v28 }
 0x7df   :  { %v909_v58 = vsel %vm908_vm4, %v1254_v43, %v905_v57 }
 0x7e0   :  { %v911_v60 = vmul.f32 %v909_v58, %v1587_v19  ;;  %1063 = vmatpush.msrb.mxu2 %v1059_v2 }
 0x7e2   :  { %v914_v17 = vmul.f32 %v1213_v47, %v911_v60  ;;  %1064 = vmatpush.msrb.mxu2 %v1058_v3 }
 0x7e4   :  { %v1096_v62 = vpop.permute.xlu0 %1095  ;;  %v917_v63 = vadd.f32 %v1214_v51, %v914_v17  ;;  %1065 = vmatpush.msrb.mxu2 %v1057_v4 }
 0x7e5   :  { %v1109_v1 = vsel %vm1107_vm11, %v1106_v61, %v1096_v62 }
 0x7e6   :  { %v1112_v40 = vsel %vm1110_vm12, %v1109_v1, %v1102_v26  ;;  %919 = vst.msk [vmem:[#allocation4 + $0x8] sm:$0xff] %vm51_vm0, %v917_v63  ;;  %1190 = vmatmul.msk.f32.gmra.mxu1 %vm51_vm0, %v917_v63  ;;  %1066 = vmatpush.msrb.mxu2 %v1056_v44 }
 0x7e7   :  { %1114 = vst.msk [vmem:[%s1728_s11 + $0x8] sm:$0xff] %vm51_vm0, %v1112_v40  ;;  %s1132_s11 = sshll.u32 %s1326_s8, 4  ;;  %s1133_s11 = int_to_ptr.vmem [resolvable:$true] %s1132_s11 }
 0x7e8   :  { %1067 = vmatpush.msrb.mxu2 %v1055_v11  ;;  %1140 = dma.vmem_to_hbm [thread:$0]  %s1133_s11, 256, %s1135_s15, [#allocation5], %s1327_s16, %s1327_s16, %s1322_s4  }
 0x7ea   :  { %1068 = vmatpush.msrb.mxu2 %v1054_v13 }
 0x7ec   :  { %1069 = vmatpush.msrb.mxu2 %v1053_v14 }
 0x7ee   :  { %1070 = vmatpush.msrb.mxu2 %v1052_v16 }
 0x7f0   :  { %1071 = vmatpush.msrb.mxu2 %v1051_v21 }
 0x7f2   :  { %1072 = vmatpush.msrb.mxu2 %v1050_v30 }
 0x7f4   :  { %1073 = vmatpush.msrb.mxu2 %v1049_v25 }
 0x7f6   :  { %1074 = vmatpush.msrb.mxu2 %v1048_v31 }
 0x7f8   :  { %1075 = vmatpush.msrb.mxu2 %v1047_v34 }
 0x7fa   :  { %1076 = vmatpush.msrb.mxu2 %v1046_v39 }
 0x7fc   :  { %1077 = vmatpush.msrb.mxu2 %v1045_v6 }
 0x85b   :  { %v951_v7 = vpop.f32.mrf.mxu1 }
 0x85c   :  { %v1653_v9 = vadd.f32 %v1215_v35, %v951_v7 }
 0x85e   :  { %v1659_v12 = vmul.f32 0.70710677, %v1653_v9  ;;  %v957_v25 = vmul.f32 0.5, %v1653_v9  ;;  %v1216_v9 = vld [vmem:[%s1722_s5 + $0x3] ss:$0 sm:$0xff] }
 0x860   :  { %v961_v5 = vmul.f32 %v1659_v12, %v1659_v12 }
 0x862   :  { %v962_v15 = vmin.f32 %v961_v5, 16.0 }
 0x863   :  { %v954_v18 = vpop.f32.mrf.mxu1 }
 0x864   :  { %v963_v33 = vmul.f32 2.1237322e-06, %v962_v15  ;;  %v974_v19 = vmul.f32 3.8918573e-05, %v962_v15  ;;  %v1672_v20 = vadd.f32 %v1215_v35, %v954_v18 }
 0x866   :  { %v964_v22 = vadd.f32 0.00028619796, %v963_v33  ;;  %v975_v23 = vadd.f32 0.001143296, %v974_v19  ;;  %v1681_v59 = vmul.f32 0.70710677, %v1672_v20 }
 0x868   :  { %v965_v0 = vmul.f32 %v964_v22, %v962_v15  ;;  %v976_v24 = vmul.f32 %v975_v23, %v962_v15  ;;  %v1001_v27 = vmul.f32 %v1681_v59, %v1681_v59 }
 0x86a   :  { %v977_v29 = vadd.f32 0.014752088, %v976_v24  ;;  %v966_v8 = vadd.f32 0.0036580483, %v965_v0  ;;  %v1002_v10 = vmin.f32 %v1001_v27, 16.0 }
 0x86c   :  { %v978_v32 = vmul.f32 %v977_v29, %v962_v15  ;;  %v1003_v36 = vmul.f32 2.1237322e-06, %v1002_v10  ;;  %v1014_v37 = vmul.f32 3.8918573e-05, %v1002_v10  ;;  %v967_v41 = vmul.f32 %v966_v8, %v962_v15 }
 0x86e   :  { %v979_v38 = vadd.f32 0.112945676, %v978_v32  ;;  %v1004_v42 = vadd.f32 0.00028619796, %v1003_v36  ;;  %v1015_v43 = vadd.f32 0.001143296, %v1014_v37 }
 0x86f   :  { %v968_v49 = vadd.f32 0.05243302, %v967_v41  ;;  %v958_v37 = vmul.f32 0.5, %v1672_v20 }
 0x870   :  { %v980_v45 = vmul.f32 %v979_v38, %v962_v15  ;;  %v1005_v46 = vmul.f32 %v1004_v42, %v1002_v10  ;;  %v1016_v47 = vmul.f32 %v1015_v43, %v1002_v10 }
 0x871   :  { %v969_v55 = vmul.f32 %v968_v49, %v962_v15 }
 0x872   :  { %v981_v48 = vadd.f32 0.4994258, %v980_v45  ;;  %v1017_v50 = vadd.f32 0.014752088, %v1016_v47  ;;  %v1006_v52 = vadd.f32 0.0036580483, %v1005_v46 }
 0x873   :  { %v970_v60 = vadd.f32 0.18741608, %v969_v55 }
 0x874   :  { %v982_v51 = vmul.f32 %v981_v48, %v962_v15  ;;  %v1018_v53 = vmul.f32 %v1017_v50, %v1002_v10  ;;  %v1007_v57 = vmul.f32 %v1006_v52, %v1002_v10 }
 0x875   :  { %v971_v26 = vmul.f32 %v970_v60, %v962_v15 }
 0x876   :  { %v983_v54 = vadd.f32 1.0, %v982_v51  ;;  %v1019_v56 = vadd.f32 0.112945676, %v1018_v53  ;;  %v1008_v61 = vadd.f32 0.05243302, %v1007_v57 }
 0x877   :  { %v972_v35 = vadd.f32 1.1283791, %v971_v26 }
 0x878   :  { %1255 = vrcp.f32 %v983_v54  ;;  %v1020_v58 = vmul.f32 %v1019_v56, %v1002_v10  ;;  %v1009_v28 = vmul.f32 %v1008_v61, %v1002_v10  ;;  %v995_v3 = vand.u32 2147483648, %v983_v54 }
 0x879   :  { %v993_v44 = vand.u32 2147483647, %v983_v54  ;;  %vm989_vm5 = vweird.f32 %v983_v54  ;;  %v973_v14 = vmul.f32 %v972_v35, %v1659_v12 }
 0x87a   :  { %v1021_v17 = vadd.f32 0.4994258, %v1020_v58  ;;  %v1010_v7 = vadd.f32 0.18741608, %v1009_v28  ;;  %v996_v13 = vor.u32 1.1754944e-38, %v995_v3 }
 0x87b   :  { %vm994_vm7 = vcmp.eq.f32.partialorder %v993_v44, 8.507059e+37 }
 0x87c   :  { %v1022_v62 = vmul.f32 %v1021_v17, %v1002_v10  ;;  %v1011_v18 = vmul.f32 %v1010_v7, %v1002_v10 }
 0x87e   :  { %v1256_v63 = vpop.eup %1255  ;;  %v1023_v40 = vadd.f32 1.0, %v1022_v62  ;;  %v1012_v30 = vadd.f32 1.1283791, %v1011_v18 }
 0x87f   :  { %v985_v1 = vmul.f32 %v1256_v63, %v983_v54  ;;  %vm990_vm1 = vweird.f32 %v1256_v63 }
 0x880   :  { %1257 = vrcp.f32 %v1023_v40  ;;  %vm991_vm6 = vmor %vm989_vm5, %vm990_vm1  ;;  %v1035_v23 = vand.u32 2147483648, %v1023_v40  ;;  %v1033_v24 = vand.u32 2147483647, %v1023_v40  ;;  %vm1029_vm9 = vweird.f32 %v1023_v40 }
 0x881   :  { %v986_v2 = vsub.f32 1.0, %v985_v1  ;;  %v1013_v8 = vmul.f32 %v1012_v30, %v1681_v59 }
 0x882   :  { %v1036_v12 = vor.u32 1.1754944e-38, %v1035_v23  ;;  %vm1034_vm11 = vcmp.eq.f32.partialorder %v1033_v24, 8.507059e+37 }
 0x883   :  { %v987_v4 = vmul.f32 %v1256_v63, %v986_v2 }
 0x885   :  { %v988_v11 = vadd.f32 %v1256_v63, %v987_v4 }
 0x886   :  { %v1258_v5 = vpop.eup %1257 }
 0x887   :  { %v992_v16 = vsel %vm991_vm6, %v1256_v63, %v988_v11  ;;  %v1025_v33 = vmul.f32 %v1258_v5, %v1023_v40  ;;  %vm1030_vm8 = vweird.f32 %v1258_v5 }
 0x888   :  { %v997_v15 = vsel %vm994_vm7, %v996_v13, %v992_v16  ;;  %vm1031_vm10 = vmor %vm1029_vm9, %vm1030_vm8 }
 0x889   :  { %v998_v19 = vmul.f32 %v997_v15, %v973_v14  ;;  %v1026_v21 = vsub.f32 1.0, %v1025_v33 }
 0x88b   :  { %v1191_v22 = vclamps-f32 %v998_v19, 1.0  ;;  %v1027_v0 = vmul.f32 %v1258_v5, %v1026_v21 }
 0x88d   :  { %v1041_v27 = vadd.f32 1.0, %v1191_v22  ;;  %v1028_v29 = vadd.f32 %v1258_v5, %v1027_v0 }
 0x88f   :  { %v1043_v31 = vmul.f32 %v1041_v27, %v957_v25  ;;  %v1032_v10 = vsel %vm1031_vm10, %v1258_v5, %v1028_v29 }
 0x890   :  { %v1037_v32 = vsel %vm1034_vm11, %v1036_v12, %v1032_v10 }
 0x891   :  { %1078 = vmatmul.f32.vlgmr.msrb.gmra.mxu2 %v1043_v31  ;;  %v1038_v34 = vmul.f32 %v1037_v32, %v1013_v8 }
 0x893   :  { %v1192_v36 = vclamps-f32 %v1038_v34, 1.0 }
 0x895   :  { %v1042_v38 = vadd.f32 1.0, %v1192_v36 }
 0x897   :  { %v1044_v39 = vmul.f32 %v1042_v38, %v958_v37 }
 0x899   :  { %1081 = vmatmul.f32.gmra.mxu2 %v1044_v39 }
 0x914   :  { %v1079_v59 = vpop.f32.mrf.mxu2 }
 0x915   :  { %v1080_v20 = vadd.f32 %v1216_v9, %v1079_v59 }
 0x917   :  { %1085 = vst.msk [vmem:[#allocation2] sm:$0xff] %vm51_vm0, %v1080_v20 }
 0x91c   :  { %v1082_v41 = vpop.f32.mrf.mxu2 }
 0x91d   :  { %v1083_v42 = vadd.f32 %v1216_v9, %v1082_v41 }
 0x91f   :  { %1086 = vst.msk [vmem:[#allocation2 + $0x8] sm:$0xff] %vm51_vm0, %v1083_v42 }
 0x920   :  { %1127 = dma.vmem_to_hbm [thread:$0]  %s1120_s18, 256, %s1122_s20, [#allocation3], %s1327_s16, %s1327_s16, %s1322_s4  }
 0x921   :  { %1307 = dma.done.wait [#allocation3], 256  }
 0x922   :  { %1308 = vsyncadd [#allocation3], 4294967040 }
 0x923   :  { %1309 = dma.done.wait [#allocation5], 256  }
 0x924   :  { %1310 = vsyncadd [#allocation5], 4294967040 }
 0x925   :  { %1153 = vsyncpa [#allocation3], 1 }
 0x926   :  { %1154 = vsyncpa [#allocation5], 1 }

</bundles_post_ra>
